<compile_context>
chip_gen: v6e
topology: v6e:2x2x1
jax: 0.10.0
libtpu: 0.0.40
codegen_flags: <defaults>
</compile_context>

<pallas_src>
import functools

import jax
import jax.numpy as jnp
import numpy as np
from jax import lax
from jax.experimental import pallas as pl
from jax.experimental.pallas import tpu as pltpu


def _round_up(x, m):
    return ((x + m - 1) // m) * m


# ----------------------------------------------------------------------------
# Generation-aware VMEM limit and tile-size selection
# ----------------------------------------------------------------------------
def _vmem_limit_bytes():
    """~48 MiB on v7x (64 MiB physical per TC), ~96 MiB on v5e/v6e (128 MiB)."""
    cap = 64 << 20                     # conservative default = v7x per-TC VMEM
    try:
        info = pltpu.get_tpu_info()
        cap = int(getattr(info, "vmem_capacity_bytes", cap) or cap)
    except Exception:
        pass
    limit = min(int(cap * 3 // 4), 110 << 20)
    return max(limit, 32 << 20)


def _choose_tile_m(M, bytes_per_row, fixed_bytes, vmem_limit):
    """Largest row tile that keeps the working set under ~half the VMEM limit
    AFTER subtracting the resident weight/selection/bias bytes; kept to a
    multiple of 128 rows, >=2 grid steps when M allows, and an even number of
    grid steps when cheap (v7x: two TensorCores split the 'parallel' axis)."""
    budget = max(vmem_limit // 2 - fixed_bytes, 2 << 20)
    t = int(budget // max(bytes_per_row, 1))
    t = max(128, min(t, 2048))
    t = min(t, max(128, _round_up(-(-M // 2), 128)))      # >= 2 steps when possible
    t = max(128, (t // 128) * 128)
    steps = -(-M // t)
    if steps > 1 and steps % 2 == 1:                       # prefer an even step count
        t2 = _round_up(-(-M // (steps + 1)), 128)
        if t2 >= 128 and (-(-M // t2)) % 2 == 0:
            t = t2
    return t


# ----------------------------------------------------------------------------
# Pallas kernels
# ----------------------------------------------------------------------------
def _icq_kernel_packed(p_ref, w_ref, s_ref, b_ref, o_ref, *, n_quad):
    """out_channels < 128: one narrow MXU pass + select + 0/1 selection matmul."""
    # z = P @ [Wq_packed | Wl | 0-pad]   -- f32 accumulation on the MXU.
    z = jnp.dot(p_ref[...], w_ref[...], preferred_element_type=jnp.float32)
    # Square only the quadratic columns (VPU select, no data movement).
    col = lax.broadcasted_iota(jnp.int32, z.shape, 1)
    u = jnp.where(col < n_quad, z * z, z)
    # 0/1 selection matmul performs the rank-sum AND adds the linear term.
    o_ref[...] = (jnp.dot(u, s_ref[...], preferred_element_type=jnp.float32)
                  + b_ref[...]).astype(o_ref.dtype)


def _icq_kernel_grouped(p_ref, w_ref, b_ref, o_ref, *, rank, out_pad):
    """out_channels >= 128: per-group dots accumulate directly (no wide z slab)."""
    p = p_ref[...]
    acc = jnp.dot(p, w_ref[:, rank * out_pad:(rank + 1) * out_pad],
                  preferred_element_type=jnp.float32) + b_ref[...]
    for r in range(rank):
        zr = jnp.dot(p, w_ref[:, r * out_pad:(r + 1) * out_pad],
                     preferred_element_type=jnp.float32)
        acc = acc + zr * zr
    o_ref[...] = acc.astype(o_ref.dtype)


# ----------------------------------------------------------------------------
# pallas_call wrappers
# ----------------------------------------------------------------------------
def _icq_matmul_packed(patches, w_packed, sel, bias2d, *, n_quad, out_pad):
    M, K = patches.shape
    ncols = w_packed.shape[1]
    itemsize = jnp.dtype(patches.dtype).itemsize
    vmem_limit = _vmem_limit_bytes()

    fixed = 2 * K * ncols * itemsize + ncols * out_pad * 4 + out_pad * 4
    per_row = (2 * K * itemsize          # double-buffered patch tile
               + 2 * out_pad * 4         # double-buffered output tile (f32)
               + 2 * ncols * 4           # z and u intermediates (f32)
               + out_pad * 4)            # accumulator
    tile_m = _choose_tile_m(M, per_row, fixed, vmem_limit)

    cost = pl.CostEstimate(
        flops=int(2 * M * K * ncols + 2 * M * ncols * out_pad + 2 * M * ncols),
        transcendentals=0,
        bytes_accessed=int(M * K * itemsize + K * ncols * itemsize
                           + ncols * out_pad * 4 + out_pad * 4 + M * out_pad * 4))

    kern = functools.partial(_icq_kernel_packed, n_quad=n_quad)
    return pl.pallas_call(
        kern,
        out_shape=jax.ShapeDtypeStruct((M, out_pad), jnp.float32),
        grid=(pl.cdiv(M, tile_m),),
        in_specs=[
            pl.BlockSpec((tile_m, K), lambda i: (i, 0)),
            pl.BlockSpec((K, ncols), lambda i: (0, 0)),
            pl.BlockSpec((ncols, out_pad), lambda i: (0, 0)),
            pl.BlockSpec((1, out_pad), lambda i: (0, 0)),
        ],
        out_specs=pl.BlockSpec((tile_m, out_pad), lambda i: (i, 0)),
        compiler_params=pltpu.CompilerParams(
            dimension_semantics=("parallel",),
            vmem_limit_bytes=vmem_limit),
        cost_estimate=cost,
    )(patches, w_packed, sel, bias2d)


def _icq_matmul_grouped(patches, w_cat, bias2d, *, rank, out_pad):
    M, K = patches.shape
    ncols = w_cat.shape[1]                     # (rank + 1) * out_pad
    itemsize = jnp.dtype(patches.dtype).itemsize
    vmem_limit = _vmem_limit_bytes()

    fixed = 2 * K * ncols * itemsize + out_pad * 4
    per_row = (2 * K * itemsize              # double-buffered patch tile
               + 2 * out_pad * 4             # double-buffered output tile (f32)
               + 2 * out_pad * 4)            # zr + accumulator (f32)
    tile_m = _choose_tile_m(M, per_row, fixed, vmem_limit)

    cost = pl.CostEstimate(
        flops=int(2 * M * K * ncols + 3 * M * rank * out_pad + M * out_pad),
        transcendentals=0,
        bytes_accessed=int(M * K * itemsize + K * ncols * itemsize
                           + out_pad * 4 + M * out_pad * 4))

    kern = functools.partial(_icq_kernel_grouped, rank=rank, out_pad=out_pad)
    return pl.pallas_call(
        kern,
        out_shape=jax.ShapeDtypeStruct((M, out_pad), jnp.float32),
        grid=(pl.cdiv(M, tile_m),),
        in_specs=[
            pl.BlockSpec((tile_m, K), lambda i: (i, 0)),
            pl.BlockSpec((K, ncols), lambda i: (0, 0)),
            pl.BlockSpec((1, out_pad), lambda i: (0, 0)),
        ],
        out_specs=pl.BlockSpec((tile_m, out_pad), lambda i: (i, 0)),
        compiler_params=pltpu.CompilerParams(
            dimension_semantics=("parallel",),
            vmem_limit_bytes=vmem_limit),
        cost_estimate=cost,
    )(patches, w_cat, bias2d)


# ----------------------------------------------------------------------------
# Glue: NHWC im2col (plain JAX) and the module wrapper
# ----------------------------------------------------------------------------
def _im2col_nhwc(x_nhwc, kh, kw, stride, padding, dilation):
    """x_nhwc: (N, H, W, C) -> (N*OH*OW, KH*KW*C), flattening order (kh, kw, c)."""
    n, h, w, c = x_nhwc.shape
    xp = jnp.pad(x_nhwc, ((0, 0), (padding, padding), (padding, padding), (0, 0)))
    oh = (h + 2 * padding - dilation * (kh - 1) - 1) // stride + 1
    ow = (w + 2 * padding - dilation * (kw - 1) - 1) // stride + 1
    cols = []
    for i in range(kh):
        for j in range(kw):
            sl = xp[:,
                    i * dilation: i * dilation + stride * (oh - 1) + 1: stride,
                    j * dilation: j * dilation + stride * (ow - 1) + 1: stride,
                    :]                                        # (N, OH, OW, C)
            cols.append(sl)
    patches = jnp.concatenate(cols, axis=-1)                  # (N, OH, OW, KH*KW*C)
    return patches.reshape(n * oh * ow, kh * kw * c), oh, ow


class Conv2dConvexQuadraticPallas:
    """Convolutional Input-Convex Quadratic layer (forward only)."""

    def __init__(self, in_channels, out_channels, kernel_size, rank,
                 stride=1, padding=0, dilation=1, groups=1, bias=True,
                 padding_mode='zeros', key=None, compute_dtype=jnp.bfloat16):
        assert rank > 0
        assert groups == 1, "only groups=1 implemented"
        assert padding_mode == 'zeros'
        self.in_channels = in_channels
        self.out_channels = out_channels
        self.kernel_size = kernel_size
        self.rank = rank
        self.stride = stride
        self.padding = padding
        self.dilation = dilation
        self.has_bias = bias
        self.compute_dtype = compute_dtype

        if key is None:
            key = jax.random.PRNGKey(0)
        k1, k2, k3 = jax.random.split(key, 3)
        fan_in = in_channels * kernel_size * kernel_size
        bound = 1.0 / np.sqrt(fan_in)
        # Same shapes as the PyTorch nn.Conv2d weights (OIHW), kept in f32 for
        # the reference path.  Quadratic conv-output channel index = o*rank + r.
        self.w_quad = jax.random.uniform(
            k1, (out_channels * rank, in_channels, kernel_size, kernel_size),
            jnp.float32, -bound, bound)
        self.w_lin = jax.random.uniform(
            k2, (out_channels, in_channels, kernel_size, kernel_size),
            jnp.float32, -bound, bound)
        self.b_lin = (jax.random.uniform(k3, (out_channels,), jnp.float32,
                                         -bound, bound)
                      if bias else jnp.zeros((out_channels,), jnp.float32))

        # -------- fused matmul weights --------------------------------------
        k_dim = in_channels * kernel_size * kernel_size
        self.k_dim = k_dim
        out_pad = _round_up(out_channels, 128)     # lane-dense output width
        self.out_pad = out_pad

        # Flatten filters in (kh, kw, cin) order to match the NHWC im2col.
        wq_k = self.w_quad.transpose(0, 2, 3, 1).reshape(out_channels * rank, k_dim)
        wl_k = self.w_lin.transpose(0, 2, 3, 1).reshape(out_channels, k_dim)

        # Per the perf review: only use the per-rank-128-lane layout when
        # out_channels >= 128; otherwise pack the quad columns contiguously
        # (small out_channels is memory-bound, so the packed layout's smaller
        # weight/z footprint dominates).
        self.use_packed = out_channels < 128

        if self.use_packed:
            n_quad = out_channels * rank
            ncols = _round_up(n_quad + out_channels, 128)
            self.n_quad = n_quad
            # Quad columns rank-major: col = r*out_c + o.
            wq_cols = wq_k.reshape(out_channels, rank, k_dim).transpose(1, 0, 2)
            wq_cols = wq_cols.reshape(n_quad, k_dim).T          # (K, n_quad)
            w_packed = jnp.concatenate([wq_cols, wl_k.T], axis=1)
            w_packed = jnp.pad(w_packed, ((0, 0), (0, ncols - w_packed.shape[1])))
            self.w_packed = w_packed.astype(compute_dtype)
            # 0/1 selection matrix: rank-sum of the quad columns + pass-through
            # of the linear columns, in one matmul.  Exact in f32.
            sel = np.zeros((ncols, out_pad), np.float32)
            oc = np.arange(out_channels)
            for r in range(rank):
                sel[r * out_channels + oc, oc] = 1.0
            sel[n_quad + oc, oc] = 1.0
            self.sel = jnp.asarray(sel)
        else:
            # Per-rank lane-aligned groups: col = r*out_pad + o, linear last.
            wq3 = wq_k.reshape(out_channels, rank, k_dim).transpose(1, 2, 0)
            wq3 = jnp.pad(wq3, ((0, 0), (0, 0), (0, out_pad - out_channels)))
            wq_big = wq3.transpose(1, 0, 2).reshape(k_dim, rank * out_pad)
            wl_pad = jnp.pad(wl_k.T, ((0, 0), (0, out_pad - out_channels)))
            self.w_cat = jnp.concatenate([wq_big, wl_pad], axis=1).astype(compute_dtype)

        self.bias2d = jnp.pad(self.b_lin, (0, out_pad - out_channels)
                              ).reshape(1, out_pad).astype(jnp.float32)

    def __call__(self, x):
        # x: (N, C_in, H, W) NCHW float32.  Output: NCHW float32.
        n = x.shape[0]
        # Cast BEFORE im2col so the (M, K) patch tensor is written once, at
        # compute precision (halves im2col bytes for bf16).
        x_nhwc = jnp.transpose(x, (0, 2, 3, 1)).astype(self.compute_dtype)
        patches, oh, ow = _im2col_nhwc(x_nhwc, self.kernel_size, self.kernel_size,
                                       self.stride, self.padding, self.dilation)
        if self.use_packed:
            y = _icq_matmul_packed(patches, self.w_packed, self.sel, self.bias2d,
                                   n_quad=self.n_quad, out_pad=self.out_pad)
        else:
            y = _icq_matmul_grouped(patches, self.w_cat, self.bias2d,
                                    rank=self.rank, out_pad=self.out_pad)
        # Fuse the channel slice with the NHWC->NCHW transpose (one XLA copy).
        y = y[:, :self.out_channels].reshape(n, oh, ow, self.out_channels)
        return jnp.transpose(y, (0, 3, 1, 2))


# ----------------------------------------------------------------------------
# Pure-JAX reference (mirrors the PyTorch forward) for verification
# ----------------------------------------------------------------------------
def _reference_forward(mod, x):
    def conv(x, w):
        return lax.conv_general_dilated(
            x, w,
            window_strides=(mod.stride, mod.stride),
            padding=[(mod.padding, mod.padding)] * 2,
            rhs_dilation=(mod.dilation, mod.dilation),
            dimension_numbers=('NCHW', 'OIHW', 'NCHW'))
    q = conv(x, mod.w_quad) ** 2
    n, c, h, w = q.shape
    q = q.reshape(n, c // mod.rank, mod.rank, h, w).sum(2)
    lin = conv(x, mod.w_lin) + mod.b_lin[None, :, None, None]
    return q + lin


if __name__ == "__main__":
    key = jax.random.PRNGKey(0)
    k_in, k_mod, k_in2, k_mod2 = jax.random.split(key, 4)

    # ---- Config A: small out_channels -> packed layout + selection matmul ----
    N, C_IN, H, W = 2, 4, 16, 16
    OUT_C, KSIZE, RANK = 8, 3, 4
    x = jax.random.normal(k_in, (N, C_IN, H, W), jnp.float32)

    mod_f32 = Conv2dConvexQuadraticPallas(
        C_IN, OUT_C, KSIZE, RANK, stride=1, padding=1, dilation=1,
        bias=True, key=k_mod, compute_dtype=jnp.float32)
    y_f32 = jax.block_until_ready(mod_f32(x))
    y_ref = jax.block_until_ready(_reference_forward(mod_f32, x))
    np.testing.assert_allclose(np.asarray(y_f32), np.asarray(y_ref),
                               rtol=1e-3, atol=1e-3)

    mod_bf16 = Conv2dConvexQuadraticPallas(
        C_IN, OUT_C, KSIZE, RANK, stride=1, padding=1, dilation=1,
        bias=True, key=k_mod, compute_dtype=jnp.bfloat16)
    y_bf16 = jax.block_until_ready(mod_bf16(x))
    np.testing.assert_allclose(np.asarray(y_bf16), np.asarray(y_ref),
                               rtol=5e-2, atol=5e-2)

    # ---- Config B: out_channels >= 128 -> grouped layout, accumulating dots ----
    N2, C2, H2, W2 = 2, 4, 8, 8
    OUT2, K2, RANK2 = 128, 3, 2
    x2 = jax.random.normal(k_in2, (N2, C2, H2, W2), jnp.float32)
    mod_g = Conv2dConvexQuadraticPallas(
        C2, OUT2, K2, RANK2, stride=1, padding=1, dilation=1,
        bias=True, key=k_mod2, compute_dtype=jnp.float32)
    y_g = jax.block_until_ready(mod_g(x2))
    y_g_ref = jax.block_until_ready(_reference_forward(mod_g, x2))
    np.testing.assert_allclose(np.asarray(y_g), np.asarray(y_g_ref),
                               rtol=1e-3, atol=1e-3)

    print("KERNEL_OK")
</pallas_src>

<mosaic_0001>
module attributes {stable_mosaic.version = 11 : i64} {
  func.func @_icq_kernel_packed(%arg0: i32, %arg1: memref<256x36xf32, #tpu.memory_space<vmem>>, %arg2: memref<36x128xf32, #tpu.memory_space<vmem>>, %arg3: memref<128x128xf32, #tpu.memory_space<vmem>>, %arg4: memref<1x128xf32, #tpu.memory_space<vmem>>, %arg5: memref<256x128xf32, #tpu.memory_space<vmem>>) attributes {dimension_semantics = [#tpu.dimension_semantics<parallel>], iteration_bounds = array<i64: 2>, scalar_prefetch = 0 : i64, scratch_operands = 0 : i64, tpu.core_type = #tpu.core_type<tc>, window_params = [{transform_indices = @transform_0, window_bounds = array<i64: 256, 36>}, {pipeline_mode = #tpu.pipeline_mode<synchronous>, transform_indices = @transform_1, window_bounds = array<i64: 36, 128>}, {pipeline_mode = #tpu.pipeline_mode<synchronous>, transform_indices = @transform_2, window_bounds = array<i64: 128, 128>}, {pipeline_mode = #tpu.pipeline_mode<synchronous>, transform_indices = @transform_3, window_bounds = array<i64: 1, 128>}, {transform_indices = @transform_4, window_bounds = array<i64: 256, 128>}]} {
    %c0 = arith.constant 0 : index
    %c0_0 = arith.constant 0 : index
    %0 = vector.load %arg1[%c0, %c0_0] : memref<256x36xf32, #tpu.memory_space<vmem>>, vector<256x36xf32>
    %c0_1 = arith.constant 0 : index
    %c0_2 = arith.constant 0 : index
    %1 = vector.load %arg2[%c0_1, %c0_2] : memref<36x128xf32, #tpu.memory_space<vmem>>, vector<36x128xf32>
    %cst = arith.constant dense<0.000000e+00> : vector<256x128xf32>
    %2 = tpu.matmul %0, %1, %cst {dimension_numbers = #tpu.dot_dimension_numbers<[1], [0], [0], [1], [0, 0, 1, 1], [], []>} : vector<256x36xf32>, vector<36x128xf32>, vector<256x128xf32> -> vector<256x128xf32>
    %3 = tpu.iota {dimensions = array<i32: 1>} : vector<256x128xi32>
    %c32_i32 = arith.constant 32 : i32
    %4 = vector.broadcast %c32_i32 : i32 to vector<256x128xi32>
    %5 = arith.cmpi slt, %3, %4 : vector<256x128xi32>
    %6 = arith.mulf %2, %2 : vector<256x128xf32>
    %7 = arith.select %5, %6, %2 : vector<256x128xi1>, vector<256x128xf32>
    %c0_3 = arith.constant 0 : index
    %c0_4 = arith.constant 0 : index
    %8 = vector.load %arg3[%c0_3, %c0_4] : memref<128x128xf32, #tpu.memory_space<vmem>>, vector<128x128xf32>
    %cst_5 = arith.constant dense<0.000000e+00> : vector<256x128xf32>
    %9 = tpu.matmul %7, %8, %cst_5 {dimension_numbers = #tpu.dot_dimension_numbers<[1], [0], [0], [1], [0, 0, 1, 1], [], []>} : vector<256x128xf32>, vector<128x128xf32>, vector<256x128xf32> -> vector<256x128xf32>
    %c0_6 = arith.constant 0 : index
    %c0_7 = arith.constant 0 : index
    %10 = vector.load %arg4[%c0_6, %c0_7] : memref<1x128xf32, #tpu.memory_space<vmem>>, vector<1x128xf32>
    %11 = vector.broadcast %10 : vector<1x128xf32> to vector<256x128xf32>
    %12 = arith.addf %9, %11 : vector<256x128xf32>
    %c0_8 = arith.constant 0 : index
    %c0_9 = arith.constant 0 : index
    %13 = vector.load %arg5[%c0_8, %c0_9] : memref<256x128xf32, #tpu.memory_space<vmem>>, vector<256x128xf32>
    tpu.vector_store %arg5[%c0_8, %c0_9], %12 {strides = array<i32>} : memref<256x128xf32, #tpu.memory_space<vmem>>, vector<256x128xf32>,
    return
  }
  func.func @transform_0(%arg0: i32) -> (i32, i32) {
    %c0_i32 = arith.constant 0 : i32
    %c0_i32_0 = arith.constant 0 : i32
    return %arg0, %c0_i32 : i32, i32
  }
  func.func @transform_1(%arg0: i32) -> (i32, i32) {
    %c0_i32 = arith.constant 0 : i32
    %c0_i32_0 = arith.constant 0 : i32
    %c0_i32_1 = arith.constant 0 : i32
    return %c0_i32, %c0_i32_0 : i32, i32
  }
  func.func @transform_2(%arg0: i32) -> (i32, i32) {
    %c0_i32 = arith.constant 0 : i32
    %c0_i32_0 = arith.constant 0 : i32
    %c0_i32_1 = arith.constant 0 : i32
    return %c0_i32, %c0_i32_0 : i32, i32
  }
  func.func @transform_3(%arg0: i32) -> (i32, i32) {
    %c0_i32 = arith.constant 0 : i32
    %c0_i32_0 = arith.constant 0 : i32
    %c0_i32_1 = arith.constant 0 : i32
    return %c0_i32, %c0_i32_0 : i32, i32
  }
  func.func @transform_4(%arg0: i32) -> (i32, i32) {
    %c0_i32 = arith.constant 0 : i32
    %c0_i32_0 = arith.constant 0 : i32
    return %arg0, %c0_i32 : i32, i32
  }
}

</mosaic_0001>

<bundles_post_ra>
// kernel: tpu_custom_call.1
= control target key start
LH: loop header
LB: loop body
LE: loop exit
PB: predicated region body
PF: predicated region fallthrough
CT: control target
= control target key end

     0   :  { %9 = vsyncpa [#allocation3], 0  ;;  %s1791_s0 = inlined_call_operand.vmem [shape: f32[512,36], index: 0, kind: input, shape index: {}]   ;;  %s1792_s1 = inlined_call_operand.vmem [shape: f32[36,128], index: 1, kind: input, shape index: {}]   ;;  %s1793_s2 = inlined_call_operand.vmem [shape: f32[128,128], index: 2, kind: input, shape index: {}]   ;;  %s1794_s3 = inlined_call_operand.vmem [shape: f32[1,128], index: 3, kind: input, shape index: {}]   ;;  %s1795_s4 = inlined_call_operand.hbm [shape: f32[512,128], index: 4, kind: output, shape index: {}]  }
   0x1   :  { %11 = vsyncpa [#allocation3 + $0x1], 0  ;;  %s1418_s15 = smov 0   ;;  %s1420_s16 = smov 0  }
   0x2   :  { %s1422_s17 = smov 0   ;;  %s1424_s18 = smov 0  }
   0x3 LB: > { %s1439_s19 = sadd.s32 4294967295, %s1388_s18   ;;  %s985_s20 = sadd.s32 4294967294, %s1388_s18   ;;  %s1388_s18 = sphi %s1424_s18, %s1801_s18   ;;  %s1384_s17 = sphi %s1422_s17, %s1800_s17   ;;  %s1380_s16 = sphi %s1420_s16, %s1799_s16   ;;  %s1376_s15 = sphi %s1418_s15, %s1798_s15  }
   0x4   : > { %s1443_s21 = sadd.s32 1, %s1388_s18   ;;  %s113_s22 = sadd.s32 1, %s1384_s17 }
   0x5   : > { %s110_s23 = ssub.s32 %s1388_s18, %s1443_s21  ;;  %p123_p0 = scmp.ne.s32.totalorder %s1384_s17, %s1380_s16 }
   0x6   : > { %p111_p1 = scmp.eq.s32.totalorder %s110_s23, 0  ;;  %p124_p2 = scmp.eq.s32.totalorder %s1439_s19, 1 }
   0x7   : > { %p129_p3 = scmp.ne.s32.totalorder %s1380_s16, %s1376_s15  ;;  %p130_p4 = scmp.eq.s32.totalorder %s985_s20, 1 }
   0x8   : > { %s1454_s24 = scalar_select %p111_p1, %s1384_s17, %s113_s22  }
   0x9   : > { %p1456_p5 = por %p124_p2, %p123_p0  ;;  %p1460_p6 = por %p130_p4, %p129_p3 }
   0xa   : > { %p988_p7 = scmp.ge.s32.totalorder %s1388_s18, 1  ;;  %p166_p8 = scmp.lt.s32.totalorder %s1388_s18, 3 }
   0xc   : > { %p167_p9 = pnand %p988_p7, %p166_p8 }
   0xd   : > { %s990_s5 = sshll.u32 (!%p167_p9), %s1439_s19, 5  ;;  %s1031_s28 = sshll.u32 (!%p167_p9), %s1439_s19, 12 }
   0xe   : > { %170 = sbr.rel (%p167_p9) target bundleno = 500 (0x1f4), region = 36  ;;  %p193_p10 = scmp.lt.s32.totalorder (!%p167_p9), %s990_s5, 63 }
   0xf   : > { %s1742_s7 = scalar_lea.hbm (!%p167_p9), %s1795_s4, %s1031_s28  ;;  %s1390_s9 = smov (!%p167_p9), [#allocation2]  }
  0x10   : > { %s1332_s10 = sshll.u32 (!%p167_p9), %s1390_s9, 4  ;;  %s1333_s10 = int_to_ptr.vmem [resolvable:$false] %s1332_s10 }
  0x11   : > { %s1334_s11 = scalar_lea.vmem (!%p167_p9), %s1333_s10, 8192 }
  0x13   : > { %v235_v0 = vld [vmem:[%s1792_s1 + $0x20] sm:$0xf]  ;;  %vm333_vm0 = vcmask 1043456   ;;  %v234_v1 = vld [vmem:[%s1792_s1 + $0x18] sm:$0xff]  ;;  %v233_v3 = vld [vmem:[%s1792_s1 + $0x10] sm:$0xff]  ;;  %s1803_s5 = smov (!%p193_p10, %s990_s5), 63  ;;  %v562_v53 = vlaneseq }
  0x14   : > { %1117 = vmatprep.subr.msk.mxu0 %vm333_vm0, %v235_v0  ;;  %v644_v2 = vld [vmem:[%s1793_s2 + $0x78] sm:$0xff]  ;;  %v643_v4 = vld [vmem:[%s1793_s2 + $0x70] sm:$0xff]  ;;  %v232_v5 = vld [vmem:[%s1792_s1 + $0x8] sm:$0xff]  ;;  %s991_s14 = sshll.u32 %s1803_s5, 3  ;;  %vm236_vm1 = vcmask 293888  }
  0x15   : > { %1118 = vmatpush3.msk.msra.mxu0 %vm333_vm0, %v235_v0  ;;  %1255 = vmatprep.subr.mxu1 %v644_v2  ;;  %v642_v6 = vld [vmem:[%s1793_s2 + $0x68] sm:$0xff]  ;;  %v231_v7 = vld [vmem:[%s1792_s1] sm:$0xff]  ;;  %s1494_s30 = scalar_lea.vmem %s1791_s0, %s991_s14  ;;  %v640_v13 = vld [vmem:[%s1793_s2 + $0x58] sm:$0xff]  ;;  %v1599_v54 = vand.u32 127, %v562_v53 }
  0x16   : > { %1119 = vmatprep.subr.mxu0 %v234_v1  ;;  %1271 = vmatpush3.msra.mxu1 %v644_v2  ;;  %v199_v8 = vld [vmem:[%s1494_s30] sm:$0xff]  ;;  %v200_v9 = vld [vmem:[%s1494_s30 + $0x8] sm:$0xff]  ;;  %v201_v11 = vld [vmem:[%s1494_s30 + $0x10] sm:$0xff] }
  0x17   : > { %1120 = vmatpush3.msra.mxu0 %v234_v1  ;;  %1256 = vmatprep.subr.mxu1 %v643_v4  ;;  %v641_v10 = vld [vmem:[%s1793_s2 + $0x60] sm:$0xff]  ;;  %v202_v12 = vld [vmem:[%s1494_s30 + $0x18] sm:$0xff]  ;;  %v204_v15 = vld [vmem:[%s1494_s30 + $0x28] sm:$0xff]  ;;  %vm564_vm2 = vcmp.lt.s32.totalorder %v1599_v54, 32 }
  0x18   : > { %1121 = vmatprep.subr.mxu0 %v233_v3  ;;  %1272 = vmatpush3.msra.mxu1 %v643_v4  ;;  %v203_v14 = vld [vmem:[%s1494_s30 + $0x20] sm:$0xff]  ;;  %v639_v16 = vld [vmem:[%s1793_s2 + $0x50] sm:$0xff]  ;;  %v206_v18 = vld [vmem:[%s1494_s30 + $0x38] sm:$0xff] }
  0x19   : > { %1122 = vmatpush3.msra.mxu0 %v233_v3  ;;  %1257 = vmatprep.subr.mxu1 %v642_v6  ;;  %v205_v17 = vld [vmem:[%s1494_s30 + $0x30] sm:$0xff]  ;;  %v638_v19 = vld [vmem:[%s1793_s2 + $0x48] sm:$0xff]  ;;  %v207_v20 = vld [vmem:[%s1494_s30 + $0x40] sm:$0xff] }
  0x1a   : > { %1123 = vmatprep.subr.mxu0 %v232_v5  ;;  %1273 = vmatpush3.msra.mxu1 %v642_v6  ;;  %v637_v21 = vld [vmem:[%s1793_s2 + $0x40] sm:$0xff]  ;;  %v208_v22 = vld [vmem:[%s1494_s30 + $0x48] sm:$0xff]  ;;  %v636_v23 = vld [vmem:[%s1793_s2 + $0x38] sm:$0xff] }
  0x1b   : > { %1124 = vmatpush3.msra.mxu0 %v232_v5  ;;  %1127 = vmatprep.mubr.msk.f32.mxu0 %vm236_vm1, %v199_v8  ;;  %v209_v24 = vld [vmem:[%s1494_s30 + $0x50] sm:$0xff]  ;;  %v210_v26 = vld [vmem:[%s1494_s30 + $0x58] sm:$0xff]  ;;  %v634_v27 = vld [vmem:[%s1793_s2 + $0x28] sm:$0xff] }
  0x1c   : > { %1125 = vmatprep.subr.mxu0 %v231_v7  ;;  %1258 = vmatprep.subr.mxu1 %v641_v10  ;;  %v635_v25 = vld [vmem:[%s1793_s2 + $0x30] sm:$0xff]  ;;  %v211_v28 = vld [vmem:[%s1494_s30 + $0x60] sm:$0xff]  ;;  %v212_v30 = vld [vmem:[%s1494_s30 + $0x68] sm:$0xff] }
  0x1d   : > { %1126 = vmatpush3.msra.mxu0 %v231_v7  ;;  %1274 = vmatpush3.msra.mxu1 %v641_v10  ;;  %v633_v29 = vld [vmem:[%s1793_s2 + $0x20] sm:$0xff]  ;;  %v632_v31 = vld [vmem:[%s1793_s2 + $0x18] sm:$0xff]  ;;  %v213_v32 = vld [vmem:[%s1494_s30 + $0x70] sm:$0xff] }
  0x1e   : > { %1128 = vmatmul.mubr.msk.f32.vlgmr.msra.gmra.mxu0 %vm236_vm1, %v200_v9  ;;  %1175 = vmatprep.subr.mxu0 %v644_v2  ;;  %v214_v33 = vld [vmem:[%s1494_s30 + $0x78] sm:$0xff]  ;;  %v215_v34 = vld [vmem:[%s1494_s30 + $0x80] sm:$0xff]  ;;  %v216_v35 = vld [vmem:[%s1494_s30 + $0x88] sm:$0xff] }
  0x1f   : > { %1130 = vmatprep.mubr.msk.f32.mxu0 %vm236_vm1, %v201_v11  ;;  %1176 = vmatpush3.msra.mxu0 %v644_v2  ;;  %v217_v36 = vld [vmem:[%s1494_s30 + $0x90] sm:$0xff]  ;;  %v218_v37 = vld [vmem:[%s1494_s30 + $0x98] sm:$0xff]  ;;  %v219_v38 = vld [vmem:[%s1494_s30 + $0xa0] sm:$0xff] }
  0x20   : > { %1177 = vmatprep.subr.mxu0 %v643_v4  ;;  %1259 = vmatprep.subr.mxu1 %v640_v13  ;;  %v220_v39 = vld [vmem:[%s1494_s30 + $0xa8] sm:$0xff]  ;;  %v221_v40 = vld [vmem:[%s1494_s30 + $0xb0] sm:$0xff]  ;;  %v222_v41 = vld [vmem:[%s1494_s30 + $0xb8] sm:$0xff] }
  0x21   : > { %1178 = vmatpush3.msra.mxu0 %v643_v4  ;;  %1275 = vmatpush3.msra.mxu1 %v640_v13  ;;  %v223_v42 = vld [vmem:[%s1494_s30 + $0xc0] sm:$0xff]  ;;  %v224_v43 = vld [vmem:[%s1494_s30 + $0xc8] sm:$0xff]  ;;  %v225_v44 = vld [vmem:[%s1494_s30 + $0xd0] sm:$0xff] }
  0x22   : > { %1131 = vmatmul.mubr.msk.f32.gmra.mxu0 %vm236_vm1, %v202_v12  ;;  %1179 = vmatprep.subr.mxu0 %v642_v6  ;;  %v226_v45 = vld [vmem:[%s1494_s30 + $0xd8] sm:$0xff]  ;;  %v227_v46 = vld [vmem:[%s1494_s30 + $0xe0] sm:$0xff]  ;;  %v228_v47 = vld [vmem:[%s1494_s30 + $0xe8] sm:$0xff] }
  0x23   : > { %1133 = vmatprep.mubr.msk.f32.mxu0 %vm236_vm1, %v203_v14  ;;  %1180 = vmatpush3.msra.mxu0 %v642_v6  ;;  %v229_v48 = vld [vmem:[%s1494_s30 + $0xf0] sm:$0xff]  ;;  %v230_v49 = vld [vmem:[%s1494_s30 + $0xf8] sm:$0xff]  ;;  %v630_v51 = vld [vmem:[%s1793_s2 + $0x8] sm:$0xff]  ;;  %s189_s30 = sand.u32 1, %s1380_s16  }
  0x24   : > { %1181 = vmatprep.subr.mxu0 %v641_v10  ;;  %1260 = vmatprep.subr.mxu1 %v639_v16  ;;  %v631_v50 = vld [vmem:[%s1793_s2 + $0x10] sm:$0xff]  ;;  %v629_v52 = vld [vmem:[%s1793_s2] sm:$0xff]  ;;  %s989_s20 = sshll.u32 %s189_s30, 8  ;;  %s1751_s19 = scalar_lea.sflag [#allocation3], %s189_s30 }
  0x25   : > { %1182 = vmatpush3.msra.mxu0 %v641_v10  ;;  %1276 = vmatpush3.msra.mxu1 %v639_v16  ;;  %s1675_s27 = scalar_lea.vmem [#allocation2], %s989_s20 }
  0x26   : > { %1134 = vmatmul.mubr.msk.f32.gmra.mxu0 %vm236_vm1, %v204_v15  ;;  %1183 = vmatprep.subr.mxu0 %v640_v13  ;;  %s923_s29 = sshll.u32 %s1675_s27, 4  ;;  %s1744_s29 = int_to_ptr.vmem [resolvable:$true] %s923_s29 }
  0x27   : > { %1136 = vmatprep.mubr.msk.f32.mxu0 %vm236_vm1, %v205_v17  ;;  %1184 = vmatpush3.msra.mxu0 %v640_v13  ;;  %s1328_s8 = scalar_lea.vmem %s1744_s29, 4096  ;;  %p1335_p0 = scmp.lt.s32.totalorder %s1744_s29, %s1333_s10 }
  0x28   : > { %1185 = vmatprep.subr.mxu0 %v639_v16  ;;  %1261 = vmatprep.subr.mxu1 %v638_v19  ;;  %p1329_p11 = scmp.ne.s32.totalorder %s1744_s29, %s1328_s8  ;;  %p1336_p1 = scmp.lt.s32.totalorder %s1334_s11, %s1328_s8 }
  0x29   : > { %1186 = vmatpush3.msra.mxu0 %v639_v16  ;;  %1277 = vmatpush3.msra.mxu1 %v638_v19 }
  0x2a   : > { %1137 = vmatmul.mubr.msk.f32.gmra.mxu0 %vm236_vm1, %v206_v18  ;;  %1187 = vmatprep.subr.mxu0 %v638_v19  ;;  %p1330_p12 = pnand %p1329_p11, %p1456_p5  ;;  %p1337_p2 = por %p1336_p1, %p1335_p0 }
  0x2b   : > { %1139 = vmatprep.mubr.msk.f32.mxu0 %vm236_vm1, %v207_v20  ;;  %1188 = vmatpush3.msra.mxu0 %v638_v19 }
  0x2c   : > { %1189 = vmatprep.subr.mxu0 %v637_v21  ;;  %1262 = vmatprep.subr.mxu1 %v637_v21  ;;  %p1331_p13 = pneg %p1330_p12 }
  0x2d   : > { %1190 = vmatpush3.msra.mxu0 %v637_v21  ;;  %1278 = vmatpush3.msra.mxu1 %v637_v21 }
  0x2e   : > { %1140 = vmatmul.mubr.msk.f32.gmra.mxu0 %vm236_vm1, %v208_v22  ;;  %1191 = vmatprep.subr.mxu0 %v636_v23  ;;  %p1338_p3 = pnand %p1337_p2, %p1331_p13 }
  0x2f   : > { %1142 = vmatprep.mubr.msk.f32.mxu0 %vm236_vm1, %v209_v24  ;;  %1192 = vmatpush3.msra.mxu0 %v636_v23 }
  0x30   : > { %1193 = vmatprep.subr.mxu0 %v635_v25  ;;  %1263 = vmatprep.subr.mxu1 %v636_v23 }
  0x31   : > { %1194 = vmatpush3.msra.mxu0 %v635_v25  ;;  %1279 = vmatpush3.msra.mxu1 %v636_v23 }
  0x32   : > { %1143 = vmatmul.mubr.msk.f32.gmra.mxu0 %vm236_vm1, %v210_v26  ;;  %1195 = vmatprep.subr.mxu0 %v634_v27 }
  0x33   : > { %1145 = vmatprep.mubr.msk.f32.mxu0 %vm236_vm1, %v211_v28  ;;  %1196 = vmatpush3.msra.mxu0 %v634_v27 }
  0x34   : > { %1197 = vmatprep.subr.mxu0 %v633_v29  ;;  %1264 = vmatprep.subr.mxu1 %v635_v25 }
  0x35   : > { %1198 = vmatpush3.msra.mxu0 %v633_v29  ;;  %1280 = vmatpush3.msra.mxu1 %v635_v25 }
  0x36   : > { %1146 = vmatmul.mubr.msk.f32.gmra.mxu0 %vm236_vm1, %v212_v30  ;;  %1199 = vmatprep.subr.mxu0 %v632_v31 }
  0x37   : > { %1148 = vmatprep.mubr.msk.f32.mxu0 %vm236_vm1, %v213_v32  ;;  %1200 = vmatpush3.msra.mxu0 %v632_v31 }
  0x38   : > { %1265 = vmatprep.subr.mxu1 %v634_v27  ;;  %1201 = vmatprep.subr.mxu0 %v631_v50 }
  0x39   : > { %1281 = vmatpush3.msra.mxu1 %v634_v27  ;;  %1202 = vmatpush3.msra.mxu0 %v631_v50 }
  0x3a   : > { %1149 = vmatmul.mubr.msk.f32.gmra.mxu0 %vm236_vm1, %v214_v33  ;;  %1266 = vmatprep.subr.mxu1 %v633_v29 }
  0x3b   : > { %1151 = vmatprep.mubr.msk.f32.mxu0 %vm236_vm1, %v215_v34  ;;  %1282 = vmatpush3.msra.mxu1 %v633_v29 }
  0x3c   : > { %1267 = vmatprep.subr.mxu1 %v632_v31  ;;  %1203 = vmatprep.subr.mxu0 %v630_v51 }
  0x3d   : > { %1283 = vmatpush3.msra.mxu1 %v632_v31  ;;  %1204 = vmatpush3.msra.mxu0 %v630_v51 }
  0x3e   : > { %1152 = vmatmul.mubr.msk.f32.gmra.mxu0 %vm236_vm1, %v216_v35  ;;  %1268 = vmatprep.subr.mxu1 %v631_v50 }
  0x3f   : > { %1154 = vmatprep.mubr.msk.f32.mxu0 %vm236_vm1, %v217_v36  ;;  %1284 = vmatpush3.msra.mxu1 %v631_v50 }
  0x40   : > { %1269 = vmatprep.subr.mxu1 %v630_v51  ;;  %1205 = vmatprep.subr.mxu0 %v629_v52 }
  0x41   : > { %1285 = vmatpush3.msra.mxu1 %v630_v51  ;;  %1206 = vmatpush3.msra.mxu0 %v629_v52 }
  0x42   : > { %1155 = vmatmul.mubr.msk.f32.gmra.mxu0 %vm236_vm1, %v218_v37  ;;  %1270 = vmatprep.subr.mxu1 %v629_v52 }
  0x43   : > { %1157 = vmatprep.mubr.msk.f32.mxu0 %vm236_vm1, %v219_v38  ;;  %1286 = vmatpush3.msra.mxu1 %v629_v52 }
  0x46   : > { %1158 = vmatmul.mubr.msk.f32.gmra.mxu0 %vm236_vm1, %v220_v39 }
  0x47   : > { %1160 = vmatprep.mubr.msk.f32.mxu0 %vm236_vm1, %v221_v40 }
  0x4a   : > { %1161 = vmatmul.mubr.msk.f32.gmra.mxu0 %vm236_vm1, %v222_v41 }
  0x4b   : > { %1163 = vmatprep.mubr.msk.f32.mxu0 %vm236_vm1, %v223_v42 }
  0x4e   : > { %1164 = vmatmul.mubr.msk.f32.gmra.mxu0 %vm236_vm1, %v224_v43 }
  0x4f   : > { %1166 = vmatprep.mubr.msk.f32.mxu0 %vm236_vm1, %v225_v44 }
  0x52   : > { %1167 = vmatmul.mubr.msk.f32.gmra.mxu0 %vm236_vm1, %v226_v45 }
  0x53   : > { %1169 = vmatprep.mubr.msk.f32.mxu0 %vm236_vm1, %v227_v46 }
  0x56   : > { %1170 = vmatmul.mubr.msk.f32.gmra.mxu0 %vm236_vm1, %v228_v47 }
  0x57   : > { %1172 = vmatprep.mubr.msk.f32.mxu0 %vm236_vm1, %v229_v48 }
  0x5a   : > { %1173 = vmatmul.mubr.msk.f32.gmra.mxu0 %vm236_vm1, %v230_v49 }
  0xde   : > { %v1129_v55 = vpop.f32.mrf.mxu0 }
  0xdf   : > { %v566_v56 = vmul.f32 %v1129_v55, %v1129_v55 }
  0xe0   : > { %v403_v57 = vpop.f32.mrf.mxu0 }
  0xe1   : > { %v565_v58 = vmul.f32 %v403_v57, %v403_v57  ;;  %v598_v61 = vsel %vm564_vm2, %v566_v56, %v1129_v55 }
  0xe2   : > { %v1132_v59 = vpop.f32.mrf.mxu0 }
  0xe3   : > { %v597_v60 = vsel %vm564_vm2, %v565_v58, %v403_v57  ;;  %v568_v62 = vmul.f32 %v1132_v59, %v1132_v59 }
  0xe4   : > { %v413_v63 = vpop.f32.mrf.mxu0  ;;  %1207 = vmatprep.mubr.f32.mxu0 %v597_v60 }
  0xe5   : > { %v567_v0 = vmul.f32 %v413_v63, %v413_v63  ;;  %1208 = vmatmul.mubr.f32.vlgmr.msra.gmra.mxu0 %v598_v61  ;;  %v600_v5 = vsel %vm564_vm2, %v568_v62, %v1132_v59 }
  0xe6   : > { %v1135_v1 = vpop.f32.mrf.mxu0 }
  0xe7   : > { %v599_v2 = vsel %vm564_vm2, %v567_v0, %v413_v63  ;;  %v570_v3 = vmul.f32 %v1135_v1, %v1135_v1 }
  0xe8   : > { %v423_v4 = vpop.f32.mrf.mxu0  ;;  %1210 = vmatprep.mubr.f32.mxu0 %v599_v2 }
  0xe9   : > { %v569_v6 = vmul.f32 %v423_v4, %v423_v4  ;;  %1211 = vmatmul.mubr.f32.gmra.mxu0 %v600_v5  ;;  %v602_v11 = vsel %vm564_vm2, %v570_v3, %v1135_v1 }
  0xea   : > { %v1138_v7 = vpop.f32.mrf.mxu0 }
  0xeb   : > { %v601_v8 = vsel %vm564_vm2, %v569_v6, %v423_v4  ;;  %v572_v9 = vmul.f32 %v1138_v7, %v1138_v7 }
  0xec   : > { %v433_v10 = vpop.f32.mrf.mxu0  ;;  %1213 = vmatprep.mubr.f32.mxu1 %v601_v8 }
  0xed   : > { %v571_v12 = vmul.f32 %v433_v10, %v433_v10  ;;  %1214 = vmatmul.mubr.f32.vlgmr.msra.gmra.mxu1 %v602_v11  ;;  %v604_v17 = vsel %vm564_vm2, %v572_v9, %v1138_v7 }
  0xee   : > { %v1141_v13 = vpop.f32.mrf.mxu0 }
  0xef   : > { %v603_v14 = vsel %vm564_vm2, %v571_v12, %v433_v10  ;;  %v574_v15 = vmul.f32 %v1141_v13, %v1141_v13 }
  0xf0   : > { %v443_v16 = vpop.f32.mrf.mxu0  ;;  %1216 = vmatprep.mubr.f32.mxu1 %v603_v14 }
  0xf1   : > { %v573_v18 = vmul.f32 %v443_v16, %v443_v16  ;;  %1217 = vmatmul.mubr.f32.gmra.mxu1 %v604_v17  ;;  %v606_v23 = vsel %vm564_vm2, %v574_v15, %v1141_v13 }
  0xf2   : > { %v1144_v19 = vpop.f32.mrf.mxu0 }
  0xf3   : > { %v605_v20 = vsel %vm564_vm2, %v573_v18, %v443_v16  ;;  %v576_v21 = vmul.f32 %v1144_v19, %v1144_v19 }
  0xf4   : > { %v453_v22 = vpop.f32.mrf.mxu0  ;;  %1219 = vmatprep.mubr.f32.mxu1 %v605_v20 }
  0xf5   : > { %v575_v24 = vmul.f32 %v453_v22, %v453_v22  ;;  %1220 = vmatmul.mubr.f32.gmra.mxu1 %v606_v23  ;;  %v608_v29 = vsel %vm564_vm2, %v576_v21, %v1144_v19 }
  0xf6   : > { %v1147_v25 = vpop.f32.mrf.mxu0 }
  0xf7   : > { %v607_v26 = vsel %vm564_vm2, %v575_v24, %v453_v22  ;;  %v578_v27 = vmul.f32 %v1147_v25, %v1147_v25  ;;  %v1672_v24 = vld [vmem:[%s1794_s3] ss:$0 sm:$0xff] }
  0xf8   : > { %v463_v28 = vpop.f32.mrf.mxu0  ;;  %1222 = vmatprep.mubr.f32.mxu1 %v607_v26 }
  0xf9   : > { %v577_v30 = vmul.f32 %v463_v28, %v463_v28  ;;  %1223 = vmatmul.mubr.f32.gmra.mxu1 %v608_v29  ;;  %v610_v35 = vsel %vm564_vm2, %v578_v27, %v1147_v25 }
  0xfa   : > { %v1150_v31 = vpop.f32.mrf.mxu0 }
  0xfb   : > { %v609_v32 = vsel %vm564_vm2, %v577_v30, %v463_v28  ;;  %v580_v33 = vmul.f32 %v1150_v31, %v1150_v31 }
  0xfc   : > { %v473_v34 = vpop.f32.mrf.mxu0  ;;  %1225 = vmatprep.mubr.f32.mxu1 %v609_v32 }
  0xfd   : > { %v579_v36 = vmul.f32 %v473_v34, %v473_v34  ;;  %1226 = vmatmul.mubr.f32.gmra.mxu1 %v610_v35  ;;  %v612_v41 = vsel %vm564_vm2, %v580_v33, %v1150_v31 }
  0xfe   : > { %v1153_v37 = vpop.f32.mrf.mxu0 }
  0xff   : > { %v611_v38 = vsel %vm564_vm2, %v579_v36, %v473_v34  ;;  %v582_v39 = vmul.f32 %v1153_v37, %v1153_v37 }
 0x100   : > { %v483_v40 = vpop.f32.mrf.mxu0  ;;  %1228 = vmatprep.mubr.f32.mxu1 %v611_v38 }
 0x101   : > { %v581_v42 = vmul.f32 %v483_v40, %v483_v40  ;;  %1229 = vmatmul.mubr.f32.gmra.mxu1 %v612_v41  ;;  %v614_v47 = vsel %vm564_vm2, %v582_v39, %v1153_v37 }
 0x102   : > { %v1156_v43 = vpop.f32.mrf.mxu0 }
 0x103   : > { %v613_v44 = vsel %vm564_vm2, %v581_v42, %v483_v40  ;;  %v584_v45 = vmul.f32 %v1156_v43, %v1156_v43 }
 0x104   : > { %v493_v46 = vpop.f32.mrf.mxu0  ;;  %1231 = vmatprep.mubr.f32.mxu1 %v613_v44 }
 0x105   : > { %v583_v48 = vmul.f32 %v493_v46, %v493_v46  ;;  %1232 = vmatmul.mubr.f32.gmra.mxu1 %v614_v47  ;;  %v616_v53 = vsel %vm564_vm2, %v584_v45, %v1156_v43 }
 0x106   : > { %v1159_v49 = vpop.f32.mrf.mxu0 }
 0x107   : > { %v615_v50 = vsel %vm564_vm2, %v583_v48, %v493_v46  ;;  %v586_v51 = vmul.f32 %v1159_v49, %v1159_v49 }
 0x108   : > { %v503_v52 = vpop.f32.mrf.mxu0  ;;  %1234 = vmatprep.mubr.f32.mxu1 %v615_v50 }
 0x109   : > { %v585_v55 = vmul.f32 %v503_v52, %v503_v52  ;;  %1235 = vmatmul.mubr.f32.gmra.mxu1 %v616_v53  ;;  %v618_v60 = vsel %vm564_vm2, %v586_v51, %v1159_v49 }
 0x10a   : > { %v1162_v56 = vpop.f32.mrf.mxu0 }
 0x10b   : > { %v617_v57 = vsel %vm564_vm2, %v585_v55, %v503_v52  ;;  %v588_v58 = vmul.f32 %v1162_v56, %v1162_v56 }
 0x10c   : > { %v513_v59 = vpop.f32.mrf.mxu0  ;;  %1237 = vmatprep.mubr.f32.mxu1 %v617_v57 }
 0x10d   : > { %v587_v61 = vmul.f32 %v513_v59, %v513_v59  ;;  %1238 = vmatmul.mubr.f32.gmra.mxu1 %v618_v60  ;;  %v620_v2 = vsel %vm564_vm2, %v588_v58, %v1162_v56 }
 0x10e   : > { %v1165_v62 = vpop.f32.mrf.mxu0 }
 0x10f   : > { %v619_v63 = vsel %vm564_vm2, %v587_v61, %v513_v59  ;;  %v590_v0 = vmul.f32 %v1165_v62, %v1165_v62 }
 0x110   : > { %v523_v1 = vpop.f32.mrf.mxu0  ;;  %1240 = vmatprep.mubr.f32.mxu1 %v619_v63 }
 0x111   : > { %v589_v3 = vmul.f32 %v523_v1, %v523_v1  ;;  %1241 = vmatmul.mubr.f32.gmra.mxu1 %v620_v2  ;;  %v622_v8 = vsel %vm564_vm2, %v590_v0, %v1165_v62 }
 0x112   : > { %v1168_v4 = vpop.f32.mrf.mxu0 }
 0x113   : > { %v621_v5 = vsel %vm564_vm2, %v589_v3, %v523_v1  ;;  %v592_v6 = vmul.f32 %v1168_v4, %v1168_v4 }
 0x114   : > { %v533_v7 = vpop.f32.mrf.mxu0  ;;  %1243 = vmatprep.mubr.f32.mxu1 %v621_v5 }
 0x115   : > { %v591_v9 = vmul.f32 %v533_v7, %v533_v7  ;;  %1244 = vmatmul.mubr.f32.gmra.mxu1 %v622_v8  ;;  %v624_v14 = vsel %vm564_vm2, %v592_v6, %v1168_v4 }
 0x116   : > { %v1171_v10 = vpop.f32.mrf.mxu0 }
 0x117   : > { %v623_v11 = vsel %vm564_vm2, %v591_v9, %v533_v7  ;;  %v594_v12 = vmul.f32 %v1171_v10, %v1171_v10 }
 0x118   : > { %v543_v13 = vpop.f32.mrf.mxu0  ;;  %1246 = vmatprep.mubr.f32.mxu1 %v623_v11 }
 0x119   : > { %v593_v15 = vmul.f32 %v543_v13, %v543_v13  ;;  %1247 = vmatmul.mubr.f32.gmra.mxu1 %v624_v14  ;;  %v626_v20 = vsel %vm564_vm2, %v594_v12, %v1171_v10 }
 0x11a   : > { %v1174_v16 = vpop.f32.mrf.mxu0 }
 0x11b   : > { %v625_v17 = vsel %vm564_vm2, %v593_v15, %v543_v13  ;;  %v596_v18 = vmul.f32 %v1174_v16, %v1174_v16 }
 0x11c   : > { %v553_v19 = vpop.f32.mrf.mxu0  ;;  %1249 = vmatprep.mubr.f32.mxu1 %v625_v17 }
 0x11d   : > { %v595_v21 = vmul.f32 %v553_v19, %v553_v19  ;;  %1250 = vmatmul.mubr.f32.gmra.mxu1 %v626_v20  ;;  %v628_v23 = vsel %vm564_vm2, %v596_v18, %v1174_v16 }
 0x11f   : > { %v627_v22 = vsel %vm564_vm2, %v595_v21, %v553_v19 }
 0x120   : > { %1252 = vmatprep.mubr.f32.mxu1 %v627_v22 }
 0x121   : > { %1253 = vmatmul.mubr.f32.gmra.mxu1 %v628_v23 }
 0x1a5   : > { %v1209_v25 = vpop.f32.mrf.mxu0 }
 0x1a6   : > { %v724_v26 = vadd.f32 %v1209_v25, %v1672_v24 }
 0x1a7   : > { %v718_v27 = vpop.f32.mrf.mxu0 }
 0x1a8   : > { %878 = vst [vmem:[%s1675_s27 + $0x8] sm:$0xff] %v724_v26  ;;  %v719_v54 = vadd.f32 %v1672_v24, %v718_v27 }
 0x1a9   : > { %v1212_v28 = vpop.f32.mrf.mxu0 }
 0x1aa   : > { %877 = vst [vmem:[%s1675_s27] sm:$0xff] %v719_v54  ;;  %v734_v29 = vadd.f32 %v1212_v28, %v1672_v24 }
 0x1ab   : > { %v728_v30 = vpop.f32.mrf.mxu0 }
 0x1ac   : > { %880 = vst [vmem:[%s1675_s27 + $0x18] sm:$0xff] %v734_v29  ;;  %v729_v31 = vadd.f32 %v1672_v24, %v728_v30 }
 0x1ad   : > { %v1215_v32 = vpop.f32.mrf.mxu1 }
 0x1ae   : > { %879 = vst [vmem:[%s1675_s27 + $0x10] sm:$0xff] %v729_v31  ;;  %v744_v33 = vadd.f32 %v1215_v32, %v1672_v24 }
 0x1af   : > { %v738_v34 = vpop.f32.mrf.mxu1 }
 0x1b0   : > { %882 = vst [vmem:[%s1675_s27 + $0x28] sm:$0xff] %v744_v33  ;;  %v739_v35 = vadd.f32 %v1672_v24, %v738_v34 }
 0x1b1   : > { %v1218_v36 = vpop.f32.mrf.mxu1 }
 0x1b2   : > { %881 = vst [vmem:[%s1675_s27 + $0x20] sm:$0xff] %v739_v35  ;;  %v754_v37 = vadd.f32 %v1218_v36, %v1672_v24 }
 0x1b3   : > { %v748_v38 = vpop.f32.mrf.mxu1 }
 0x1b4   : > { %884 = vst [vmem:[%s1675_s27 + $0x38] sm:$0xff] %v754_v37  ;;  %v749_v39 = vadd.f32 %v1672_v24, %v748_v38 }
 0x1b5   : > { %v1221_v40 = vpop.f32.mrf.mxu1 }
 0x1b6   : > { %883 = vst [vmem:[%s1675_s27 + $0x30] sm:$0xff] %v749_v39  ;;  %v764_v41 = vadd.f32 %v1221_v40, %v1672_v24 }
 0x1b7   : > { %v758_v42 = vpop.f32.mrf.mxu1 }
 0x1b8   : > { %886 = vst [vmem:[%s1675_s27 + $0x48] sm:$0xff] %v764_v41  ;;  %v759_v43 = vadd.f32 %v1672_v24, %v758_v42 }
 0x1b9   : > { %v1224_v44 = vpop.f32.mrf.mxu1 }
 0x1ba   : > { %885 = vst [vmem:[%s1675_s27 + $0x40] sm:$0xff] %v759_v43  ;;  %v774_v45 = vadd.f32 %v1224_v44, %v1672_v24 }
 0x1bb   : > { %v768_v46 = vpop.f32.mrf.mxu1 }
 0x1bc   : > { %888 = vst [vmem:[%s1675_s27 + $0x58] sm:$0xff] %v774_v45  ;;  %v769_v47 = vadd.f32 %v1672_v24, %v768_v46 }
 0x1bd   : > { %v1227_v48 = vpop.f32.mrf.mxu1 }
 0x1be   : > { %887 = vst [vmem:[%s1675_s27 + $0x50] sm:$0xff] %v769_v47  ;;  %v784_v49 = vadd.f32 %v1227_v48, %v1672_v24 }
 0x1bf   : > { %v778_v50 = vpop.f32.mrf.mxu1 }
 0x1c0   : > { %890 = vst [vmem:[%s1675_s27 + $0x68] sm:$0xff] %v784_v49  ;;  %v779_v51 = vadd.f32 %v1672_v24, %v778_v50 }
 0x1c1   : > { %v1230_v52 = vpop.f32.mrf.mxu1 }
 0x1c2   : > { %889 = vst [vmem:[%s1675_s27 + $0x60] sm:$0xff] %v779_v51  ;;  %v794_v53 = vadd.f32 %v1230_v52, %v1672_v24 }
 0x1c3   : > { %v788_v55 = vpop.f32.mrf.mxu1 }
 0x1c4   : > { %892 = vst [vmem:[%s1675_s27 + $0x78] sm:$0xff] %v794_v53  ;;  %v789_v56 = vadd.f32 %v1672_v24, %v788_v55 }
 0x1c5   : > { %v1233_v57 = vpop.f32.mrf.mxu1 }
 0x1c6   : > { %891 = vst [vmem:[%s1675_s27 + $0x70] sm:$0xff] %v789_v56  ;;  %v804_v58 = vadd.f32 %v1233_v57, %v1672_v24 }
 0x1c7   : > { %v798_v59 = vpop.f32.mrf.mxu1 }
 0x1c8   : > { %894 = vst [vmem:[%s1675_s27 + $0x88] sm:$0xff] %v804_v58  ;;  %v799_v60 = vadd.f32 %v1672_v24, %v798_v59 }
 0x1c9   : > { %v1236_v61 = vpop.f32.mrf.mxu1 }
 0x1ca   : > { %893 = vst [vmem:[%s1675_s27 + $0x80] sm:$0xff] %v799_v60  ;;  %v814_v62 = vadd.f32 %v1236_v61, %v1672_v24 }
 0x1cb   : > { %v808_v63 = vpop.f32.mrf.mxu1 }
 0x1cc   : > { %896 = vst [vmem:[%s1675_s27 + $0x98] sm:$0xff] %v814_v62  ;;  %v809_v0 = vadd.f32 %v1672_v24, %v808_v63 }
 0x1cd   : > { %v1239_v1 = vpop.f32.mrf.mxu1 }
 0x1ce   : > { %895 = vst [vmem:[%s1675_s27 + $0x90] sm:$0xff] %v809_v0  ;;  %v824_v2 = vadd.f32 %v1239_v1, %v1672_v24 }
 0x1cf   : > { %v818_v3 = vpop.f32.mrf.mxu1 }
 0x1d0   : > { %898 = vst [vmem:[%s1675_s27 + $0xa8] sm:$0xff] %v824_v2  ;;  %v819_v4 = vadd.f32 %v1672_v24, %v818_v3 }
 0x1d1   : > { %v1242_v5 = vpop.f32.mrf.mxu1 }
 0x1d2   : > { %897 = vst [vmem:[%s1675_s27 + $0xa0] sm:$0xff] %v819_v4  ;;  %v834_v6 = vadd.f32 %v1242_v5, %v1672_v24 }
 0x1d3   : > { %v828_v7 = vpop.f32.mrf.mxu1 }
 0x1d4   : > { %900 = vst [vmem:[%s1675_s27 + $0xb8] sm:$0xff] %v834_v6  ;;  %v829_v8 = vadd.f32 %v1672_v24, %v828_v7 }
 0x1d5   : > { %v1245_v9 = vpop.f32.mrf.mxu1 }
 0x1d6   : > { %899 = vst [vmem:[%s1675_s27 + $0xb0] sm:$0xff] %v829_v8  ;;  %v844_v10 = vadd.f32 %v1245_v9, %v1672_v24 }
 0x1d7   : > { %v838_v11 = vpop.f32.mrf.mxu1 }
 0x1d8   : > { %902 = vst [vmem:[%s1675_s27 + $0xc8] sm:$0xff] %v844_v10  ;;  %v839_v12 = vadd.f32 %v1672_v24, %v838_v11 }
 0x1d9   : > { %v1248_v13 = vpop.f32.mrf.mxu1 }
 0x1da   : > { %901 = vst [vmem:[%s1675_s27 + $0xc0] sm:$0xff] %v839_v12  ;;  %v854_v14 = vadd.f32 %v1248_v13, %v1672_v24 }
 0x1db   : > { %v848_v15 = vpop.f32.mrf.mxu1 }
 0x1dc   : > { %904 = vst [vmem:[%s1675_s27 + $0xd8] sm:$0xff] %v854_v14  ;;  %v849_v16 = vadd.f32 %v1672_v24, %v848_v15 }
 0x1dd   : > { %v1251_v17 = vpop.f32.mrf.mxu1 }
 0x1de   : > { %903 = vst [vmem:[%s1675_s27 + $0xd0] sm:$0xff] %v849_v16  ;;  %v864_v18 = vadd.f32 %v1251_v17, %v1672_v24 }
 0x1df   : > { %v858_v19 = vpop.f32.mrf.mxu1 }
 0x1e0   : > { %906 = vst [vmem:[%s1675_s27 + $0xe8] sm:$0xff] %v864_v18  ;;  %v859_v20 = vadd.f32 %v1672_v24, %v858_v19 }
 0x1e1   : > { %v1254_v21 = vpop.f32.mrf.mxu1 }
 0x1e2   : > { %905 = vst [vmem:[%s1675_s27 + $0xe0] sm:$0xff] %v859_v20  ;;  %v874_v22 = vadd.f32 %v1254_v21, %v1672_v24 }
 0x1e3   : > { %v868_v23 = vpop.f32.mrf.mxu1 }
 0x1e4   : > { %908 = vst [vmem:[%s1675_s27 + $0xf8] sm:$0xff] %v874_v22  ;;  %v869_v25 = vadd.f32 %v1672_v24, %v868_v23 }
 0x1e6   : > { %907 = vst [vmem:[%s1675_s27 + $0xf0] sm:$0xff] %v869_v25 }
 0x1e7   : > { %1341 = shalt.err (!%p1338_p3)
}
 0x1e8   : > { %s1342_s12 = scalar_lea.hbm %s1742_s7, 4096  ;;  %s1346_s30 = scalar_lea.hbm %s1795_s4, 8192 }
 0x1e9   : > { %p1343_p4 = scmp.ne.s32.totalorder %s1742_s7, %s1342_s12  ;;  %p1347_p9 = scmp.lt.s32.totalorder %s1742_s7, %s1795_s4 }
 0x1ea   : > { %p1348_p10 = scmp.lt.s32.totalorder %s1346_s30, %s1342_s12 }
 0x1eb   : > { %p1344_p7 = pnand %p1343_p4, %p1456_p5 }
 0x1ec   : > { %p1349_p11 = por %p1348_p10, %p1347_p9 }
 0x1ed   : > { %p1345_p8 = pneg %p1344_p7 }
 0x1ef   : > { %p1350_p12 = pnand %p1349_p11, %p1345_p8 }
 0x1f1   : > { %1353 = shalt.err (!%p1350_p12)
}
 0x1f2   : > { %s1391_s23 = smov 128   ;;  %s1392_s27 = smov 8  }
 0x1f3   : > { %1287 = dma.vmem_to_hbm [thread:$0]  (%p1456_p5), %s1744_s29, 4096, %s1742_s7, %s1751_s19, %s1391_s23, %s1391_s23, %s1392_s27  }
 0x1f4 PF: > { %p1293_p13 = scmp.ge.s32.totalorder %s1388_s18, 2  ;;  %s938_s28 = sand.u32 1, %s1376_s15  }
 0x1f5   : > { %s939_s5 = scalar_lea.sflag [#allocation3], %s938_s28 }
 0x1f6   : > { %p1290_p0 = pnand %p1293_p13, %p1460_p6 }
 0x1f8   : > { %p1291_p1 = pneg %p1290_p0 }
 0x1fa   : > { %1371 = dma.done.wait (%p1291_p1), %s939_s5, 4096  }
 0x1fb   : > { %1373 = vsyncadd (%p1291_p1), %s939_s5, 4294963200  ;;  %p14_p2 = scmp.ge.s32.totalorder %s1443_s21, 4   ;;  %s1798_s15 = smov %s1380_s16 }
 0x1fc   : > { %s1799_s16 = smov %s1384_s17  ;;  %s1800_s17 = smov %s1454_s24 }
 0x1fd   : > { %s1801_s18 = smov %s1443_s21  ;;  %16 = sbr.rel (!%p14_p2) target bundleno = 3 (0x3), region = 71 }
 0x202   :  { %944 = vsyncpa [#allocation3], 1 }
 0x203   :  { %946 = vsyncpa [#allocation3 + $0x1], 1 }

</bundles_post_ra>
